<compile_context>
chip_gen: v7x
topology: tpu7x:2x2x1
jax: 0.10.0
libtpu: 0.0.40
codegen_flags: <defaults>
</compile_context>

<pallas_src>
import math
import functools

import jax
import jax.numpy as jnp
from jax.experimental import pallas as pl
from jax.experimental.pallas import tpu as pltpu

LANE = 128
TILE_N_MAX = 8192          # max lanes per fused-head column tile (64 x 8192 bf16 = 1 MiB)
_SCOPED_VMEM_DEFAULT = 16 << 20   # v5e default scoped-VMEM limit (smallest of the gens)


def _round_up(n, m):
    return (n + m - 1) // m * m


def _head_tiling(n_total):
    """(n_pad, tile_n, n_tiles) for the packed head output axis.

    n_pad is a multiple of tile_n; tile_n is a multiple of 128 and <= TILE_N_MAX.
    Idempotent: _head_tiling(n_pad) == (n_pad, tile_n, n_tiles).
    """
    n_lane = _round_up(max(n_total, LANE), LANE)
    if n_lane <= TILE_N_MAX:
        return n_lane, n_lane, 1
    n_tiles = pl.cdiv(n_lane, TILE_N_MAX)
    tile_n = _round_up(pl.cdiv(n_lane, n_tiles), LANE)
    return tile_n * n_tiles, tile_n, n_tiles


def _vmem_spec():
    # Whole-array block resident in VMEM (gridless fast path; shapes are small there).
    return pl.BlockSpec(memory_space=pltpu.MemorySpace.VMEM)


def simple_generator_kernel(
    x_ref,
    w1_ref, b1_ref,     # linear1: input_dim -> 128
    w2_ref, b2_ref,     # linear2: 128 -> 64
    hw_ref, hb_ref,     # fused heads: 64 -> tile_n (gamma/beta folded in, lane-padded)
    out_ref,            # [batch_pad, tile_n]
):
    x = x_ref[...]

    # linear1 + ReLU  (recomputed per column tile: MXU/VPU have huge slack, DMA is binding)
    h = jnp.dot(x, w1_ref[...], preferred_element_type=jnp.float32) + b1_ref[...]
    h = jnp.maximum(h, 0.0)

    # linear2
    h = jnp.dot(h, w2_ref[...], preferred_element_type=jnp.float32) + b2_ref[...]

    # LayerNorm(64), eps=1e-6 (biased variance, eps inside rsqrt — PyTorch semantics).
    # Affine gamma/beta are folded into hw/hb, so only normalize here.
    mean = jnp.mean(h, axis=-1, keepdims=True)
    centered = h - mean
    var = jnp.mean(centered * centered, axis=-1, keepdims=True)
    hn = centered * jax.lax.rsqrt(var + 1e-6)

    # Fused, lane-dense head matmul on the streamed weight tile (bf16 x bf16 -> f32 acc).
    hw = hw_ref[...]
    out_ref[...] = (
        jnp.dot(hn.astype(hw.dtype), hw, preferred_element_type=jnp.float32)
        + hb_ref[...]
    )


def pack_params(params, head_dtype=jnp.bfloat16):
    """Fold LayerNorm affine into the head weights, concatenate the four heads,
    pad the output axis to the kernel's tiling, and cast the (large, streamed) head
    weight to head_dtype. Done ONCE, outside the per-call path."""
    (w1, b1, w2, b2, gamma, beta,
     wu_w, wu_b, wd_w, wd_b, bu_w, bu_b, bd_w, bd_b) = params

    head_w = jnp.concatenate([wu_w, wd_w, bu_w, bd_w], axis=1)   # [64, N]
    head_b = jnp.concatenate([wu_b, wd_b, bu_b, bd_b], axis=1)   # [1, N]

    # (hn*gamma + beta) @ W + b == hn @ (gamma[:,None]*W) + (beta @ W + b)
    head_w_f = gamma.reshape(-1, 1) * head_w
    head_b_f = beta @ head_w + head_b

    n_total = head_w.shape[1]
    n_pad, _, _ = _head_tiling(n_total)
    pad = n_pad - n_total
    if pad:
        head_w_f = jnp.pad(head_w_f, ((0, 0), (0, pad)))
        head_b_f = jnp.pad(head_b_f, ((0, 0), (0, pad)))

    return (w1, b1, w2, b2,
            head_w_f.astype(head_dtype),          # streamed: halve bytes
            head_b_f.astype(jnp.float32))         # tiny: keep f32


@functools.partial(jax.jit, static_argnames=("hidden_size", "adapter_dim"))
def simple_generator_forward(x, packed, hidden_size, adapter_dim):
    w1, b1, w2, b2, hw, hb = packed
    batch, input_dim = x.shape
    n_pad = hw.shape[1]
    n_pad_chk, tile_n, n_tiles = _head_tiling(n_pad)
    assert n_pad_chk == n_pad, "packed head width inconsistent with kernel tiling"

    # Pad batch (sublane) dim to a multiple of 8 so stores are full, unmasked tiles.
    b_pad = _round_up(max(batch, 8), 8)
    if b_pad != batch:
        x = jnp.pad(x, ((0, b_pad - batch), (0, 0)))

    flops = 2 * b_pad * ((input_dim * 128 + 128 * 64) * n_tiles + 64 * n_pad)
    bytes_accessed = (4 * (x.size + w1.size + b1.size + w2.size + b2.size + hb.size)
                      + hw.size * hw.dtype.itemsize
                      + 4 * b_pad * n_pad)
    cost = pl.CostEstimate(flops=flops, transcendentals=b_pad * n_tiles,
                           bytes_accessed=bytes_accessed)
    out_shape = jax.ShapeDtypeStruct((b_pad, n_pad), jnp.float32)

    if n_tiles == 1:
        # Gridless whole-array fast path for small packed widths (grid-step overhead
        # would dominate the trivial per-tile compute).
        out = pl.pallas_call(
            simple_generator_kernel,
            out_shape=out_shape,
            in_specs=[_vmem_spec()] * 7,
            out_specs=_vmem_spec(),
            cost_estimate=cost,
        )(x, w1, b1, w2, b2, hw, hb)
    else:
        # Column-tiled grid: stream the packed head weight through VMEM in lane-dense
        # tiles.  Small operands use constant block indices -> DMA'd once.
        def const(shape):
            return pl.BlockSpec(shape, lambda j: (0, 0))

        in_specs = [
            const((b_pad, input_dim)),
            const((input_dim, 128)), const((1, 128)),
            const((128, 64)), const((1, 64)),
            # NOTE: if xprof ever shows the hw DMA exposed, try
            # pipeline_mode=pl.Buffered(3) here; default double buffering otherwise.
            pl.BlockSpec((64, tile_n), lambda j: (0, j)),
            pl.BlockSpec((1, tile_n), lambda j: (0, j)),
        ]
        out_specs = pl.BlockSpec((b_pad, tile_n), lambda j: (0, j))

        # Real pipelined VMEM footprint: double-buffered blocks (streamed + constant).
        small_bytes = 4 * (b_pad * input_dim + input_dim * 128 + 128 + 128 * 64 + 64)
        tile_bytes = (64 * tile_n * hw.dtype.itemsize   # hw tile
                      + 4 * tile_n                      # hb tile
                      + 4 * b_pad * tile_n)             # out tile
        footprint = 2 * (small_bytes + tile_bytes)

        compiler_params = pltpu.CompilerParams(dimension_semantics=("parallel",))
        if footprint > _SCOPED_VMEM_DEFAULT:
            try:
                vmem_cap = pltpu.get_tpu_info().vmem_capacity_bytes
            except Exception:
                vmem_cap = 64 << 20   # v7x physical VMEM: smallest across generations
            compiler_params = pltpu.CompilerParams(
                dimension_semantics=("parallel",),
                vmem_limit_bytes=min(footprint + (4 << 20), vmem_cap - (4 << 20)))

        out = pl.pallas_call(
            simple_generator_kernel,
            out_shape=out_shape,
            grid_spec=pltpu.PrefetchScalarGridSpec(
                num_scalar_prefetch=0,
                grid=(n_tiles,),
                in_specs=in_specs,
                out_specs=out_specs,
            ),
            cost_estimate=cost,
            compiler_params=compiler_params,
        )(x, w1, b1, w2, b2, hw, hb)

    ha = hidden_size * adapter_dim
    weight_up = out[:batch, :ha]
    weight_down = out[:batch, ha:2 * ha]
    bias_up = out[:batch, 2 * ha:2 * ha + hidden_size]
    bias_down = out[:batch, 2 * ha + hidden_size:2 * ha + hidden_size + adapter_dim]
    return weight_up, weight_down, bias_up, bias_down


def make_params(key, input_dim, hidden_size, adapter_dim):
    """Deterministic parameter construction mirroring the PyTorch __init__.
    Weights returned as [in, out]; biases as [1, out]."""
    keys = jax.random.split(key, 8)

    def torch_linear(k, fan_in, fan_out):
        kw, kb = jax.random.split(k)
        bound = 1.0 / math.sqrt(fan_in)
        w = jax.random.uniform(kw, (fan_in, fan_out), jnp.float32, -bound, bound)
        b = jax.random.uniform(kb, (1, fan_out), jnp.float32, -bound, bound)
        return w, b

    def hyperfanin_linear(k, fan_in, fan_out, mainnet_in=None):
        if mainnet_in is None:
            bound = 0.001 * math.sqrt(3.0 / fan_in)                  # hyperfanin_init_bias
        else:
            bound = 0.001 * math.sqrt(3.0 / (fan_in * mainnet_in))   # hyperfanin_init_weight
        w = jax.random.uniform(k, (fan_in, fan_out), jnp.float32, -bound, bound)
        b = jnp.zeros((1, fan_out), jnp.float32)
        return w, b

    w1, b1 = torch_linear(keys[0], input_dim, 128)
    w2, b2 = torch_linear(keys[1], 128, 64)
    gamma = jnp.ones((1, 64), jnp.float32)
    beta = jnp.zeros((1, 64), jnp.float32)
    wu_w, wu_b = hyperfanin_linear(keys[2], 64, hidden_size * adapter_dim, mainnet_in=adapter_dim)
    wd_w, wd_b = hyperfanin_linear(keys[3], 64, hidden_size * adapter_dim, mainnet_in=hidden_size)
    bu_w, bu_b = hyperfanin_linear(keys[4], 64, hidden_size)
    bd_w, bd_b = hyperfanin_linear(keys[5], 64, adapter_dim)

    return (w1, b1, w2, b2, gamma, beta,
            wu_w, wu_b, wd_w, wd_b, bu_w, bu_b, bd_w, bd_b)


def reference_forward(x, params):
    """Pure-JAX f32 reference with exact PyTorch-module semantics (unfused)."""
    (w1, b1, w2, b2, gamma, beta,
     wu_w, wu_b, wd_w, wd_b, bu_w, bu_b, bd_w, bd_b) = params
    h = jnp.maximum(x @ w1 + b1, 0.0)
    h = h @ w2 + b2
    mean = jnp.mean(h, axis=-1, keepdims=True)
    var = jnp.mean((h - mean) ** 2, axis=-1, keepdims=True)
    h = (h - mean) / jnp.sqrt(var + 1e-6) * gamma + beta
    return (h @ wu_w + wu_b, h @ wd_w + wd_b, h @ bu_w + bu_b, h @ bd_w + bd_b)


def packed_reference_forward(x, packed, hidden_size, adapter_dim):
    """Pure-JAX reference that mirrors the kernel math exactly (same packed/bf16 weights)."""
    w1, b1, w2, b2, hw, hb = packed
    h = jnp.maximum(x @ w1 + b1, 0.0)
    h = h @ w2 + b2
    mean = jnp.mean(h, axis=-1, keepdims=True)
    c = h - mean
    var = jnp.mean(c * c, axis=-1, keepdims=True)
    hn = c * jax.lax.rsqrt(var + 1e-6)
    out = jnp.dot(hn.astype(hw.dtype), hw, preferred_element_type=jnp.float32) + hb
    ha = hidden_size * adapter_dim
    return (out[:, :ha], out[:, ha:2 * ha], out[:, 2 * ha:2 * ha + hidden_size],
            out[:, 2 * ha + hidden_size:2 * ha + hidden_size + adapter_dim])


def _check(outs, refs, atol, rtol):
    for o, r in zip(outs, refs):
        assert o.shape == r.shape, (o.shape, r.shape)
        assert jnp.allclose(o, r, atol=atol, rtol=rtol), float(jnp.max(jnp.abs(o - r)))


def _run_case(x, params, hidden_size, adapter_dim):
    packed = pack_params(params)
    outs = simple_generator_forward(x, packed, hidden_size, adapter_dim)
    outs = jax.block_until_ready(outs)
    # Tight check vs. a reference using identical (bf16-packed, folded) weights.
    _check(outs, packed_reference_forward(x, packed, hidden_size, adapter_dim),
           atol=2e-5, rtol=1e-3)
    # Loose check vs. the original f32 PyTorch-semantics reference
    # (tolerance accounts for bf16 quantization of the tiny hyperfanin weights).
    _check(outs, reference_forward(x, params), atol=1e-3, rtol=5e-2)
    return outs


if __name__ == "__main__":
    batch = 2
    input_dim = 32

    key = jax.random.PRNGKey(0)
    k_x, k_p, k_g, k_b, k_p2 = jax.random.split(key, 5)
    x = jax.random.normal(k_x, (batch, input_dim), jnp.float32)

    # 1) small shapes (gridless fast path), default init (gamma=1, beta=0)
    hidden_size, adapter_dim = 32, 8
    params = make_params(k_p, input_dim, hidden_size, adapter_dim)
    _run_case(x, params, hidden_size, adapter_dim)

    # 2) non-trivial LayerNorm affine — verifies the gamma/beta fold is exact in semantics
    gamma = 1.0 + 0.1 * jax.random.normal(k_g, (1, 64), jnp.float32)
    beta = 0.1 * jax.random.normal(k_b, (1, 64), jnp.float32)
    params2 = params[:4] + (gamma, beta) + params[6:]
    _run_case(x, params2, hidden_size, adapter_dim)

    # 3) wider heads (> TILE_N_MAX lanes) — exercises the column-tiled, parallel grid path
    hidden_size3, adapter_dim3 = 256, 16
    params3 = make_params(k_p2, input_dim, hidden_size3, adapter_dim3)
    _run_case(x, params3, hidden_size3, adapter_dim3)

    print("KERNEL_OK")
</pallas_src>

<mosaic_0001>
module attributes {stable_mosaic.version = 11 : i64} {
  func.func @simple_generator_kernel(%arg0: memref<8x32xf32, #tpu.memory_space<vmem>>, %arg1: memref<32x128xf32, #tpu.memory_space<vmem>>, %arg2: memref<1x128xf32, #tpu.memory_space<vmem>>, %arg3: memref<128x64xf32, #tpu.memory_space<vmem>>, %arg4: memref<1x64xf32, #tpu.memory_space<vmem>>, %arg5: memref<64x640xbf16, #tpu.memory_space<vmem>>, %arg6: memref<1x640xf32, #tpu.memory_space<vmem>>, %arg7: memref<8x640xf32, #tpu.memory_space<vmem>>) attributes {dimension_semantics = [], scalar_prefetch = 0 : i64, scratch_operands = 0 : i64, tpu.core_type = #tpu.core_type<tc>} {
    %c0 = arith.constant 0 : index
    %c0_0 = arith.constant 0 : index
    %0 = vector.load %arg0[%c0, %c0_0] : memref<8x32xf32, #tpu.memory_space<vmem>>, vector<8x32xf32>
    %c0_1 = arith.constant 0 : index
    %c0_2 = arith.constant 0 : index
    %1 = vector.load %arg1[%c0_1, %c0_2] : memref<32x128xf32, #tpu.memory_space<vmem>>, vector<32x128xf32>
    %cst = arith.constant dense<0.000000e+00> : vector<8x128xf32>
    %2 = tpu.matmul %0, %1, %cst {dimension_numbers = #tpu.dot_dimension_numbers<[1], [0], [0], [1], [0, 0, 1, 1], [], []>} : vector<8x32xf32>, vector<32x128xf32>, vector<8x128xf32> -> vector<8x128xf32>
    %c0_3 = arith.constant 0 : index
    %c0_4 = arith.constant 0 : index
    %3 = vector.load %arg2[%c0_3, %c0_4] : memref<1x128xf32, #tpu.memory_space<vmem>>, vector<1x128xf32>
    %4 = vector.broadcast %3 : vector<1x128xf32> to vector<8x128xf32>
    %5 = arith.addf %2, %4 : vector<8x128xf32>
    %cst_5 = arith.constant 0.000000e+00 : f32
    %6 = vector.broadcast %cst_5 : f32 to vector<8x128xf32>
    %7 = arith.maximumf %5, %6 : vector<8x128xf32>
    %c0_6 = arith.constant 0 : index
    %c0_7 = arith.constant 0 : index
    %8 = vector.load %arg3[%c0_6, %c0_7] : memref<128x64xf32, #tpu.memory_space<vmem>>, vector<128x64xf32>
    %cst_8 = arith.constant dense<0.000000e+00> : vector<8x64xf32>
    %9 = tpu.matmul %7, %8, %cst_8 {dimension_numbers = #tpu.dot_dimension_numbers<[1], [0], [0], [1], [0, 0, 1, 1], [], []>} : vector<8x128xf32>, vector<128x64xf32>, vector<8x64xf32> -> vector<8x64xf32>
    %c0_9 = arith.constant 0 : index
    %c0_10 = arith.constant 0 : index
    %10 = vector.load %arg4[%c0_9, %c0_10] : memref<1x64xf32, #tpu.memory_space<vmem>>, vector<1x64xf32>
    %11 = vector.broadcast %10 : vector<1x64xf32> to vector<8x64xf32>
    %12 = arith.addf %9, %11 : vector<8x64xf32>
    %cst_11 = arith.constant dense<0.000000e+00> : vector<8xf32>
    %13 = vector.multi_reduction <add>, %12, %cst_11 [1] : vector<8x64xf32> to vector<8xf32>
    %14 = vector.shape_cast %13 : vector<8xf32> to vector<8x1xf32>
    %cst_12 = arith.constant 6.400000e+01 : f32
    %15 = vector.broadcast %cst_12 : f32 to vector<8x1xf32>
    %16 = arith.divf %14, %15 : vector<8x1xf32>
    %17 = vector.broadcast %16 : vector<8x1xf32> to vector<8x64xf32>
    %18 = arith.subf %12, %17 : vector<8x64xf32>
    %19 = arith.mulf %18, %18 : vector<8x64xf32>
    %cst_13 = arith.constant dense<0.000000e+00> : vector<8xf32>
    %20 = vector.multi_reduction <add>, %19, %cst_13 [1] : vector<8x64xf32> to vector<8xf32>
    %21 = vector.shape_cast %20 : vector<8xf32> to vector<8x1xf32>
    %cst_14 = arith.constant 6.400000e+01 : f32
    %22 = vector.broadcast %cst_14 : f32 to vector<8x1xf32>
    %23 = arith.divf %21, %22 : vector<8x1xf32>
    %cst_15 = arith.constant 9.99999997E-7 : f32
    %24 = vector.broadcast %cst_15 : f32 to vector<8x1xf32>
    %25 = arith.addf %23, %24 : vector<8x1xf32>
    %26 = math.rsqrt %25 : vector<8x1xf32>
    %27 = vector.broadcast %26 : vector<8x1xf32> to vector<8x64xf32>
    %28 = arith.mulf %18, %27 : vector<8x64xf32>
    %c0_16 = arith.constant 0 : index
    %c0_17 = arith.constant 0 : index
    %29 = vector.load %arg5[%c0_16, %c0_17] : memref<64x640xbf16, #tpu.memory_space<vmem>>, vector<64x640xbf16>
    %30 = arith.truncf %28 : vector<8x64xf32> to vector<8x64xbf16>
    %cst_18 = arith.constant dense<0.000000e+00> : vector<8x640xf32>
    %31 = tpu.matmul %30, %29, %cst_18 {dimension_numbers = #tpu.dot_dimension_numbers<[1], [0], [0], [1], [0, 0, 1, 1], [], []>} : vector<8x64xbf16>, vector<64x640xbf16>, vector<8x640xf32> -> vector<8x640xf32>
    %c0_19 = arith.constant 0 : index
    %c0_20 = arith.constant 0 : index
    %32 = vector.load %arg6[%c0_19, %c0_20] : memref<1x640xf32, #tpu.memory_space<vmem>>, vector<1x640xf32>
    %33 = vector.broadcast %32 : vector<1x640xf32> to vector<8x640xf32>
    %34 = arith.addf %31, %33 : vector<8x640xf32>
    %c0_21 = arith.constant 0 : index
    %c0_22 = arith.constant 0 : index
    %35 = vector.load %arg7[%c0_21, %c0_22] : memref<8x640xf32, #tpu.memory_space<vmem>>, vector<8x640xf32>
    tpu.vector_store %arg7[%c0_21, %c0_22], %34 {strides = array<i32>} : memref<8x640xf32, #tpu.memory_space<vmem>>, vector<8x640xf32>,
    return
  }
}

</mosaic_0001>

<bundles_post_ra>
// kernel: simple_generator_forward.1
= control target key start
LH: loop header
LB: loop body
LE: loop exit
PB: predicated region body
PF: predicated region fallthrough
CT: control target
= control target key end

     0   :  { %v687_v0 = vmov 0.0|0.0   ;;  %vm688_vm0 = vmmov 0   ;;  %v689_v4 = vmov 0.0   ;;  %vm39_vm1 = vcmask 261120   ;;  %s893_s1 = inlined_call_operand.vmem [shape: f32[32,128], index: 1, kind: input, shape index: {}]   ;;  %s894_s3 = inlined_call_operand.vmem [shape: f32[128,64], index: 3, kind: input, shape index: {}]   ;;  %s895_s0 = inlined_call_operand.vmem [shape: f32[8,32], index: 0, kind: input, shape index: {}]   ;;  %s896_s2 = inlined_call_operand.vmem [shape: f32[1,128], index: 2, kind: input, shape index: {}]   ;;  %s897_s4 = inlined_call_operand.vmem [shape: f32[1,64], index: 4, kind: input, shape index: {}]   ;;  %s898_s5 = inlined_call_operand.vmem [shape: bf16[64,640], index: 5, kind: input, shape index: {}]   ;;  %s899_s6 = inlined_call_operand.vmem [shape: f32[1,640], index: 6, kind: input, shape index: {}]   ;;  %s900_s7 = inlined_call_operand.vmem [shape: f32[8,640], index: 7, kind: output, shape index: {}]  }
   0x1   :  { %623 = vmatprep.subr.bf16.mxu0 %v687_v0  ;;  %v28_v1 = vld [vmem:[%s893_s1] sm:$0xff]  ;;  %v29_v2 = vld [vmem:[%s893_s1 + $0x8] sm:$0xff]  ;;  %v30_v3 = vld [vmem:[%s893_s1 + $0x10] sm:$0xff]  ;;  %573 = vmatprep.mubr.msk.f32.mxu0 %vm688_vm0, %v689_v4  ;;  %vm207_vm2 = vcmask 523264   ;;  %v690_v61 = vmov 0  }
   0x2   :  { %v624_v5 = vpack.c.bf16 %v29_v2, %v28_v1  ;;  %v31_v6 = vld [vmem:[%s893_s1 + $0x18] sm:$0xff]  ;;  %629 = vmatprep.subr.bf16.mxu1 %v687_v0  ;;  %v114_v7 = vld [vmem:[%s894_s3] sm:$0xff]  ;;  %608 = vmatprep.mubr.msk.f32.mxu1 %vm688_vm0, %v689_v4  ;;  %v115_v8 = vld [vmem:[%s894_s3 + $0x8] sm:$0xff] }
   0x3   :  { %v116_v9 = vld [vmem:[%s894_s3 + $0x10] sm:$0xff]  ;;  %v117_v10 = vld [vmem:[%s894_s3 + $0x18] sm:$0xff]  ;;  %v627_v11 = vpack.c.bf16 %v31_v6, %v30_v3  ;;  %v630_v12 = vpack.c.bf16 %v115_v8, %v114_v7  ;;  %v118_v14 = vld [vmem:[%s894_s3 + $0x20] sm:$0xff] }
   0x4   :  { %625 = vmatpush3.bf16.msra.mxu0 %v624_v5  ;;  %v633_v13 = vpack.c.bf16 %v117_v10, %v116_v9  ;;  %v119_v15 = vld [vmem:[%s894_s3 + $0x28] sm:$0xff]  ;;  %v27_v16 = vld [vmem:[%s895_s0] sm:$0xff]  ;;  %v120_v18 = vld [vmem:[%s894_s3 + $0x30] sm:$0xff] }
   0x5   :  { %626 = vmatprep.subr.bf16.mxu0 %v687_v0  ;;  %631 = vmatpush3.bf16.msra.mxu1 %v630_v12  ;;  %v636_v17 = vpack.c.bf16 %v119_v15, %v118_v14  ;;  %v121_v19 = vld [vmem:[%s894_s3 + $0x38] sm:$0xff]  ;;  %v122_v21 = vld [vmem:[%s894_s3 + $0x40] sm:$0xff]  ;;  %v123_v22 = vld [vmem:[%s894_s3 + $0x48] sm:$0xff] }
   0x6   :  { %632 = vmatprep.subr.bf16.mxu1 %v687_v0  ;;  %v639_v20 = vpack.c.bf16 %v121_v19, %v120_v18  ;;  %v642_v23 = vpack.c.bf16 %v123_v22, %v122_v21  ;;  %v124_v24 = vld [vmem:[%s894_s3 + $0x50] sm:$0xff]  ;;  %v125_v25 = vld [vmem:[%s894_s3 + $0x58] sm:$0xff]  ;;  %v126_v27 = vld [vmem:[%s894_s3 + $0x60] sm:$0xff] }
   0x7   :  { %v645_v26 = vpack.c.bf16 %v125_v25, %v124_v24  ;;  %v127_v28 = vld [vmem:[%s894_s3 + $0x68] sm:$0xff]  ;;  %v128_v30 = vld [vmem:[%s894_s3 + $0x70] sm:$0xff]  ;;  %v129_v31 = vld [vmem:[%s894_s3 + $0x78] sm:$0xff] }
   0x8   :  { %628 = vmatpush3.bf16.msra.mxu0 %v627_v11  ;;  %v648_v29 = vpack.c.bf16 %v127_v28, %v126_v27  ;;  %v651_v32 = vpack.c.bf16 %v129_v31, %v128_v30  ;;  %v512_v33 = vld [vmem:[%s896_s2] ss:$0 sm:$0xff]  ;;  %v659_v48 = vld [vmem:[%s898_s5 + $0x4] ss:$20 sps:$4 sm:$0xff]   ;;  %v661_v52 = vld [vmem:[%s898_s5 + $0x28] ss:$20 sps:$4 sm:$0xff]   ;;  %v249_v11 = vlaneseq }
   0x9   :  { %634 = vmatpush3.bf16.msra.mxu1 %v633_v13  ;;  %v514_v38 = vld [vmem:[%s897_s4] ss:$0 sm:$0xff]  ;;  %381 = vmatprep.subr.bf16.mxu0 %v659_v48  ;;  %v660_v50 = vld [vmem:[%s898_s5 + $0x10] ss:$20 sps:$4 sm:$0xff]   ;;  %v664_v53 = vld [vmem:[%s898_s5 + $0x38] ss:$20 sps:$4 sm:$0xff]  }
   0xa   :  { %635 = vmatprep.subr.bf16.mxu1 %v687_v0  ;;  %v657_v49 = vld [vmem:[%s898_s5] ss:$20 sps:$4 sm:$0xff]   ;;  %v665_v55 = vld [vmem:[%s898_s5 + $0x50] ss:$20 sps:$4 sm:$0xff]   ;;  %v669_v58 = vld [vmem:[%s898_s5 + $0x78] ss:$20 sps:$4 sm:$0xff]  }
   0xb   :  { %574 = vmatmul.mubr.msk.f32.vlgmr.msra.gmra.mrb[0].mxu0 %vm39_vm1, %v27_v16  ;;  %v663_v51 = vld [vmem:[%s898_s5 + $0x2c] ss:$20 sps:$4 sm:$0xff]   ;;  %v667_v54 = vld [vmem:[%s898_s5 + $0x54] ss:$20 sps:$4 sm:$0xff]   ;;  %v671_v57 = vld [vmem:[%s898_s5 + $0x7c] ss:$20 sps:$4 sm:$0xff]  }
   0xc   :  { %382 = vmatpush1.bf16.msra.mxu0 %v657_v49  ;;  %v668_v56 = vld [vmem:[%s898_s5 + $0x60] ss:$20 sps:$4 sm:$0xff]   ;;  %v672_v59 = vld [vmem:[%s898_s5 + $0x88] ss:$20 sps:$4 sm:$0xff]   ;;  %413 = vmatprep.mubr.bf16.mxu0 %v690_v61  ;;  %v676_v6 = vld [vmem:[%s898_s5 + $0x30] ss:$20 sps:$4 sm:$0xff]  }
   0xd   :  { %637 = vmatpush3.bf16.msra.mxu1 %v636_v17  ;;  %383 = vmatprep.subr.bf16.mxu0 %v663_v51  ;;  %v675_v60 = vld [vmem:[%s898_s5 + $0xc] ss:$20 sps:$4 sm:$0xff]   ;;  %v673_v3 = vld [vmem:[%s898_s5 + $0x8] ss:$20 sps:$4 sm:$0xff]   ;;  %v684_v9 = vld [vmem:[%s898_s5 + $0x84] ss:$20 sps:$4 sm:$0xff]  }
   0xe   :  { %638 = vmatprep.subr.bf16.mxu1 %v687_v0  ;;  %v678_v5 = vld [vmem:[%s898_s5 + $0x34] ss:$20 sps:$4 sm:$0xff]   ;;  %v681_v7 = vld [vmem:[%s898_s5 + $0x5c] ss:$20 sps:$4 sm:$0xff]   ;;  %v679_v8 = vld [vmem:[%s898_s5 + $0x58] ss:$20 sps:$4 sm:$0xff]  }
   0xf   :  { %v682_v10 = vld [vmem:[%s898_s5 + $0x80] ss:$20 sps:$4 sm:$0xff]   ;;  %v250_v12 = vshrl.u32 %v249_v11, 7 }
  0x10   :  { %384 = vmatpush1.bf16.msra.mxu0 %v661_v52  ;;  %v247_v15 = vld [vmem:[%s899_s6] sm:$0x1f] }
  0x11   :  { %640 = vmatpush3.bf16.msra.mxu1 %v639_v20  ;;  %385 = vmatprep.subr.bf16.mxu0 %v667_v54  ;;  %v251_v13 = vsub.s32 0, %v250_v12  ;;  %v267_v14 = vsub.s32 4, %v250_v12  ;;  %v255_v16 = vsub.s32 1, %v250_v12  ;;  %v259_v31 = vsub.s32 2, %v250_v12 }
  0x12   :  { %641 = vmatprep.subr.bf16.mxu1 %v687_v0 }
  0x13   :  { %v252_v17 = vrot.slane %v247_v15, %v251_v13  ;;  %v268_v18 = vrot.slane %v247_v15, %v267_v14  ;;  %v256_v19 = vrot.slane %v247_v15, %v255_v16 }
  0x14   :  { %386 = vmatpush1.bf16.msra.mxu0 %v665_v55 }
  0x15   :  { %643 = vmatpush3.bf16.msra.mxu1 %v642_v23  ;;  %387 = vmatprep.subr.bf16.mxu0 %v671_v57 }
  0x16   :  { %644 = vmatprep.subr.bf16.mxu1 %v687_v0 }
  0x18   :  { %388 = vmatpush1.bf16.msra.mxu0 %v669_v58 }
  0x19   :  { %646 = vmatpush3.bf16.msra.mxu1 %v645_v26  ;;  %422 = vmatprep.subr.bf16.mxu0 %v675_v60 }
  0x1a   :  { %647 = vmatprep.subr.bf16.mxu1 %v687_v0 }
  0x1d   :  { %649 = vmatpush3.bf16.msra.mxu1 %v648_v29 }
  0x1e   :  { %650 = vmatprep.subr.bf16.mxu1 %v687_v0 }
  0x21   :  { %652 = vmatpush3.bf16.msra.mxu1 %v651_v32  ;;  %v263_v32 = vsub.s32 3, %v250_v12 }
  0x22   :  { %611 = vmatprep.subr.bf16.mxu1 %v689_v4 }
  0xde   :  { %v109_v34 = vpop.f32.mrb[0].mxu0 }
  0xdf   :  { %v110_v35 = vadd.f32 %v512_v33, %v109_v34  ;;  %v575_v36 = vpop.f32.mrb[1].mxu0  ;;  %v260_v33 = vrot.slane %v247_v15, %v259_v31  ;;  %v264_v34 = vrot.slane %v247_v15, %v263_v32 }
  0xe1   :  { %v113_v37 = vmax.f32 %v110_v35, 0.0 }
  0xe3   :  { %609 = vmatmul.mubr.f32.vlgmr.msra.gmra.mrb[0].mxu1 %v113_v37 }
  0xe4   :  { %619 = vmatprep.mubr.msk.bf16.mxu1 %vm688_vm0, %v689_v4  ;;  %612 = vmatpush3.bf16.msra.mxu1 %v660_v50 }
  0xe5   :  { %613 = vmatprep.subr.bf16.mxu1 %v689_v4 }
  0xe8   :  { %614 = vmatpush3.bf16.msra.mxu1 %v664_v53 }
  0xe9   :  { %615 = vmatprep.subr.bf16.mxu1 %v689_v4 }
  0xec   :  { %616 = vmatpush3.bf16.msra.mxu1 %v668_v56 }
  0xed   :  { %617 = vmatprep.subr.bf16.mxu1 %v689_v4 }
  0xf0   :  { %618 = vmatpush3.bf16.msra.mxu1 %v672_v59 }
 0x1b6   :  { %v203_v39 = vpop.f32.mrb[0].mxu1 }
 0x1b7   :  { %v204_v40 = vadd.f32 %v514_v38, %v203_v39  ;;  %v610_v41 = vpop.f32.mrb[1].mxu1 }
 0x1b9   :  { %v208_v42 = vsel %vm207_vm2, %v204_v40, 0.0 }
 0x1ba   :  { %209 = vadd.xlane.f32.xlu0 %v208_v42 }
 0x247   :  { %v210_v43 = vpop.xlane.xlu0 %209 }
 0x248   :  { %v212_v44 = vmul.f32 0.015625, %v210_v43 }
 0x24a   :  { %v213_v45 = vsub.f32 %v204_v40, %v212_v44 }
 0x24c   :  { %v214_v46 = vmul.f32 %v213_v45, %v213_v45 }
 0x24e   :  { %v215_v47 = vsel %vm207_vm2, %v214_v46, 0.0 }
 0x24f   :  { %216 = vadd.xlane.f32.xlu0 %v215_v47 }
 0x2dc   :  { %v217_v62 = vpop.xlane.xlu0 %216 }
 0x2dd   :  { %v218_v63 = vmul.f32 0.015625, %v217_v62 }
 0x2df   :  { %v219_v0 = vadd.f32 1e-06, %v218_v63 }
 0x2e1   :  { %685 = vrsqrt.f32 %v219_v0 }
 0x2eb   :  { %v686_v1 = vpop.eup %685 }
 0x2ec   :  { %v221_v2 = vmul.f32 %v686_v1, %v213_v45 }
 0x2ee   :  { %v246_v4 = vpack.c.bf16 %v221_v2, %v221_v2 }
 0x2f0   :  { %535 = vmatmul.mubr.msk.bf16.vlgmr.msra.gmra.mrb[4].mxu0 %vm207_vm2, %v246_v4  ;;  %620 = vmatmul.mubr.msk.bf16.vlgmr.msra.gmra.mrb[4].mxu1 %vm207_vm2, %v246_v4 }
 0x2f1   :  { %423 = vmatpush1.bf16.msra.mxu0 %v673_v3  ;;  %454 = vmatprep.mubr.bf16.mxu0 %v690_v61 }
 0x2f2   :  { %424 = vmatprep.subr.bf16.mxu0 %v678_v5 }
 0x2f5   :  { %425 = vmatpush1.bf16.msra.mxu0 %v676_v6 }
 0x2f6   :  { %426 = vmatprep.subr.bf16.mxu0 %v681_v7 }
 0x2f9   :  { %427 = vmatpush1.bf16.msra.mxu0 %v679_v8 }
 0x2fa   :  { %428 = vmatprep.subr.bf16.mxu0 %v684_v9 }
 0x2fd   :  { %429 = vmatpush1.bf16.msra.mxu0 %v682_v10 }
 0x300   :  { %536 = vmatmul.mubr.msk.bf16.vlgmr.msra.gmra.mrb[8].mxu0 %vm207_vm2, %v246_v4 }
 0x3c3   :  { %v415_v20 = vpop.f32.mrb[4].mxu0  ;;  %v497_v21 = vpop.f32.mrb[4].mxu1 }
 0x3c4   :  { %v416_v22 = vadd.f32 %v415_v20, %v252_v17  ;;  %v498_v23 = vadd.f32 %v497_v21, %v268_v18  ;;  %v417_v24 = vpop.f32.mrb[5].mxu0  ;;  %v621_v25 = vpop.f32.mrb[5].mxu1 }
 0x3c5   :  { %v418_v26 = vadd.f32 %v417_v24, %v256_v19  ;;  %v419_v27 = vpop.f32.mrb[6].mxu0  ;;  %v500_v28 = vpop.f32.mrb[6].mxu1 }
 0x3c6   :  { %503 = vst [vmem:[%s900_s7] sm:$0xff] %v416_v22  ;;  %507 = vst [vmem:[%s900_s7 + $0x20] sm:$0xff] %v498_v23  ;;  %v420_v29 = vpop.f32.mrb[7].mxu0  ;;  %v622_v30 = vpop.f32.mrb[7].mxu1 }
 0x3c7   :  { %504 = vst [vmem:[%s900_s7 + $0x8] sm:$0xff] %v418_v26 }
 0x3d3   :  { %v456_v35 = vpop.f32.mrb[8].mxu0 }
 0x3d4   :  { %v457_v36 = vadd.f32 %v456_v35, %v260_v33  ;;  %v458_v37 = vpop.f32.mrb[9].mxu0 }
 0x3d5   :  { %v459_v38 = vadd.f32 %v458_v37, %v264_v34  ;;  %v460_v39 = vpop.f32.mrb[10].mxu0 }
 0x3d6   :  { %505 = vst [vmem:[%s900_s7 + $0x10] sm:$0xff] %v457_v36  ;;  %v461_v40 = vpop.f32.mrb[11].mxu0 }
 0x3d7   :  { %506 = vst [vmem:[%s900_s7 + $0x18] sm:$0xff] %v459_v38 }

</bundles_post_ra>
